<compile_context>
chip_gen: v5e
topology: v5e:2x2
jax: 0.10.0
libtpu: 0.0.40
codegen_flags: <defaults>
</compile_context>

<pallas_src>
import jax
import jax.numpy as jnp
from jax.experimental import pallas as pl
from jax.experimental.pallas import tpu as pltpu


def _round_up(a: int, m: int) -> int:
    return ((a + m - 1) // m) * m


def _logreg_kernel(scal_ref, x_ref, w_ref, o_ref):
    # scal_ref: (3,)    SMEM  -- [linear_bias, w_scalar, b_scalar]
    # x_ref:    (F, TN) VMEM  -- transposed input tile (batch on lanes)
    # w_ref:    (F, 1)  VMEM  -- Linear weight as a column
    # o_ref:    (1, TN) VMEM  -- lane-dense output tile
    x = x_ref[...].astype(jnp.float32)          # (F, TN)
    w_col = w_ref[...].astype(jnp.float32)      # (F, 1), broadcasts over lanes

    lin_b = scal_ref[0]
    w_s = scal_ref[1]
    b_s = scal_ref[2]
    # Fold the scalar affine once per tile: sigmoid(w_s*(y + lin_b) + b_s)
    b_eff = w_s * lin_b + b_s

    # Linear(10, 1): sublane reduction over F -> (1, TN)
    y = jnp.sum(x * w_col, axis=0, keepdims=True)
    o_ref[...] = jax.nn.sigmoid(w_s * y + b_eff)


def full_logistic_regression_forward(x, lin_w, lin_b, w, b, *, tn_max=2048):
    """x: [N, F]; lin_w: [1, F]; lin_b: [1]; w: [1]; b: [1] -> [N] float32.

    Works for f32 or bf16 x (math is done in f32 inside the kernel).
    """
    n, f = x.shape

    # Batch tile: multiple of 128 lanes, capped at tn_max (512-2048 range).
    tn = min(_round_up(tn_max, 128), _round_up(max(n, 1), 128))
    n_pad = _round_up(n, tn)

    # Lane-dense transposed layout: [F, N_pad], batch on the lane axis.
    x_t = x.T
    if n_pad != n:
        x_t = jnp.pad(x_t, ((0, 0), (0, n_pad - n)))

    w_col = lin_w.reshape(1, f).T.astype(jnp.float32)  # (F, 1)
    scalars = jnp.concatenate(
        [lin_b.reshape(1), w.reshape(1), b.reshape(1)]
    ).astype(jnp.float32)                              # (3,) -> SMEM

    grid = (n_pad // tn,)

    out = pl.pallas_call(
        _logreg_kernel,
        out_shape=jax.ShapeDtypeStruct((1, n_pad), jnp.float32),
        grid=grid,
        in_specs=[
            pl.BlockSpec(memory_space=pltpu.SMEM),        # scalars (whole, SMEM)
            pl.BlockSpec((f, tn), lambda i: (0, i)),      # x tile (F, TN)
            pl.BlockSpec((f, 1), lambda i: (0, 0)),       # weight column
        ],
        out_specs=pl.BlockSpec((1, tn), lambda i: (0, i)),  # lane-dense output
        compiler_params=pltpu.CompilerParams(
            dimension_semantics=("parallel",),            # shard across TCs on v7x
        ),
    )(scalars, x_t, w_col)

    # torch .flatten() of the [N, 1] linear output -> [N]; drop host padding.
    return out.reshape(-1)[:n]


def _reference(x, lin_w, lin_b, w, b):
    return jax.nn.sigmoid(
        w[0] * (x.astype(jnp.float32) @ lin_w.T + lin_b).reshape(-1) + b[0]
    )


if __name__ == "__main__":
    key = jax.random.PRNGKey(0)
    k_x, k_w, k_b, k_x2 = jax.random.split(key, 4)

    F = 10  # Linear(10, 1) => feature dim must be 10

    # nn.Linear-style uniform(-1/sqrt(F), 1/sqrt(F)) init.
    bound = 1.0 / (F ** 0.5)
    lin_w = jax.random.uniform(k_w, (1, F), dtype=jnp.float32, minval=-bound, maxval=bound)
    lin_b = jax.random.uniform(k_b, (1,), dtype=jnp.float32, minval=-bound, maxval=bound)
    w = jnp.array([1.0], dtype=jnp.float32)  # module's self.w
    b = jnp.array([0.0], dtype=jnp.float32)  # module's self.b

    # --- Case 1: tiny batch (single tile) ---
    N1 = 8
    x1 = jax.random.normal(k_x, (N1, F), dtype=jnp.float32)
    out1 = jax.block_until_ready(full_logistic_regression_forward(x1, lin_w, lin_b, w, b))
    ref1 = _reference(x1, lin_w, lin_b, w, b)
    assert out1.shape == (N1,)
    assert jnp.allclose(out1, ref1, atol=1e-6), (out1, ref1)

    # --- Case 2: non-multiple-of-tile batch, multi-step grid (exercise padding + pipeline) ---
    N2 = 300
    x2 = jax.random.normal(k_x2, (N2, F), dtype=jnp.float32)
    out2 = jax.block_until_ready(
        full_logistic_regression_forward(x2, lin_w, lin_b, w, b, tn_max=128)
    )
    ref2 = _reference(x2, lin_w, lin_b, w, b)
    assert out2.shape == (N2,)
    assert jnp.allclose(out2, ref2, atol=1e-6), (out2, ref2)

    print("KERNEL_OK")
</pallas_src>

<mosaic_0001>
module attributes {stable_mosaic.version = 11 : i64} {
  func.func @_logreg_kernel(%arg0: i32, %arg1: memref<3xf32, #tpu.memory_space<smem>>, %arg2: memref<10x128xf32, #tpu.memory_space<vmem>>, %arg3: memref<10x1xf32, #tpu.memory_space<vmem>>, %arg4: memref<1x128xf32, #tpu.memory_space<vmem>>) attributes {dimension_semantics = [#tpu.dimension_semantics<parallel>], iteration_bounds = array<i64: 1>, scalar_prefetch = 0 : i64, scratch_operands = 0 : i64, tpu.core_type = #tpu.core_type<tc>, window_params = [{transform_indices = @transform_0, window_bounds = array<i64: 3>}, {transform_indices = @transform_1, window_bounds = array<i64: 10, 128>}, {pipeline_mode = #tpu.pipeline_mode<synchronous>, transform_indices = @transform_2, window_bounds = array<i64: 10, 1>}, {transform_indices = @transform_3, window_bounds = array<i64: 1, 128>}]} {
    %c0 = arith.constant 0 : index
    %c0_0 = arith.constant 0 : index
    %0 = vector.load %arg2[%c0, %c0_0] : memref<10x128xf32, #tpu.memory_space<vmem>>, vector<10x128xf32>
    %c0_1 = arith.constant 0 : index
    %c0_2 = arith.constant 0 : index
    %1 = vector.load %arg3[%c0_1, %c0_2] : memref<10x1xf32, #tpu.memory_space<vmem>>, vector<10x1xf32>
    %c0_3 = arith.constant 0 : index
    %2 = memref.load %arg1[%c0_3] : memref<3xf32, #tpu.memory_space<smem>>
    %c1 = arith.constant 1 : index
    %3 = memref.load %arg1[%c1] : memref<3xf32, #tpu.memory_space<smem>>
    %c2 = arith.constant 2 : index
    %4 = memref.load %arg1[%c2] : memref<3xf32, #tpu.memory_space<smem>>
    %5 = arith.mulf %3, %2 : f32
    %6 = arith.addf %5, %4 : f32
    %7 = vector.broadcast %1 : vector<10x1xf32> to vector<10x128xf32>
    %8 = arith.mulf %0, %7 : vector<10x128xf32>
    %cst = arith.constant dense<0.000000e+00> : vector<128xf32>
    %9 = vector.multi_reduction <add>, %8, %cst [0] : vector<10x128xf32> to vector<128xf32>
    %10 = vector.shape_cast %9 : vector<128xf32> to vector<1x128xf32>
    %11 = vector.broadcast %3 : f32 to vector<1x128xf32>
    %12 = arith.mulf %11, %10 : vector<1x128xf32>
    %13 = vector.broadcast %6 : f32 to vector<1x128xf32>
    %14 = arith.addf %12, %13 : vector<1x128xf32>
    %15 = arith.negf %14 : vector<1x128xf32>
    %16 = math.exp %15 : vector<1x128xf32>
    %cst_4 = arith.constant 1.000000e+00 : f32
    %17 = vector.broadcast %cst_4 : f32 to vector<1x128xf32>
    %18 = arith.addf %17, %16 : vector<1x128xf32>
    %19 = arith.divf %17, %18 : vector<1x128xf32>
    %c0_5 = arith.constant 0 : index
    %c0_6 = arith.constant 0 : index
    %20 = vector.load %arg4[%c0_5, %c0_6] : memref<1x128xf32, #tpu.memory_space<vmem>>, vector<1x128xf32>
    tpu.vector_store %arg4[%c0_5, %c0_6], %19 {strides = array<i32>} : memref<1x128xf32, #tpu.memory_space<vmem>>, vector<1x128xf32>,
    return
  }
  func.func @transform_0(%arg0: i32) -> i32 {
    %c0_i32 = arith.constant 0 : i32
    %c0_i32_0 = arith.constant 0 : i32
    return %c0_i32 : i32
  }
  func.func @transform_1(%arg0: i32) -> (i32, i32) {
    %c0_i32 = arith.constant 0 : i32
    %c0_i32_0 = arith.constant 0 : i32
    return %c0_i32, %arg0 : i32, i32
  }
  func.func @transform_2(%arg0: i32) -> (i32, i32) {
    %c0_i32 = arith.constant 0 : i32
    %c0_i32_0 = arith.constant 0 : i32
    %c0_i32_1 = arith.constant 0 : i32
    return %c0_i32, %c0_i32_0 : i32, i32
  }
  func.func @transform_3(%arg0: i32) -> (i32, i32) {
    %c0_i32 = arith.constant 0 : i32
    %c0_i32_0 = arith.constant 0 : i32
    return %c0_i32, %arg0 : i32, i32
  }
}

</mosaic_0001>

<bundles_post_ra>
// kernel: tpu_custom_call.1
= control target key start
LH: loop header
LB: loop body
LE: loop exit
PB: predicated region body
PF: predicated region fallthrough
CT: control target
= control target key end

     0   :  { %8 = vsyncpa [#allocation4], 0  ;;  %s191_s0 = inlined_call_operand.vmem [shape: f32[3], index: 0, kind: input, shape index: {}]   ;;  %s192_s1 = inlined_call_operand.vmem [shape: f32[10,128], index: 1, kind: input, shape index: {}]   ;;  %s193_s2 = inlined_call_operand.vmem [shape: f32[10,1], index: 2, kind: input, shape index: {}]   ;;  %s194_s3 = inlined_call_operand.hbm [shape: f32[1,128], index: 3, kind: output, shape index: {}]  }
   0x1   :  { %9 = vsyncpa [#allocation3], 0  ;;  %s15_s14 = sshll.u32 %s191_s0, 4  ;;  %s150_s15 = smov [#allocation2]   ;;  %s16_s14 = int_to_ptr.vmem [resolvable:$true] %s15_s14 }
   0x2   :  { %18 = dma.vmem_to_smem %s16_s14, 16, %s150_s15, [#allocation4]  }
   0x3   :  { %146 = dma.done.wait [#allocation4], 16  }
   0x4   :  { %147 = vsyncadd [#allocation4], 4294967280 }
   0x5   :  { %27 = sfence }
   0x6   :  { %v31_v0 = vld [vmem:[%s193_s2 + $0x8] sm:$0x3]  ;;  %v151_v1 = vmov 0   ;;  %v30_v2 = vld [vmem:[%s193_s2] sm:$0xff]  ;;  %vm49_vm0 = vcmask 1041408   ;;  %s32_s23 = sld [smem:[#allocation2]] }
   0x7   :  { %105 = vset.pattern.permute.xlu0 %v151_v1  ;;  %v29_v4 = vld [vmem:[%s192_s1 + $0x8] sm:$0x3]  ;;  %v28_v6 = vld [vmem:[%s192_s1] sm:$0xff]  ;;  %s99_s24 = sld [smem:[#allocation2 + $0x1]]  ;;  %s152_s1 = smov [#allocation5]  }
   0x8   :  { %44 = vperm.xlu0 %105, %v31_v0   ;;  %s100_s25 = sld [smem:[#allocation2 + $0x2]]  ;;  %s87_s27 = sshll.u32 %s152_s1, 4  ;;  %s88_s27 = int_to_ptr.vmem [resolvable:$true] %s87_s27 }
   0x9   :  { %s89_s30 = sshll.u32 %s194_s3, 4  ;;  %s90_s30 = int_to_ptr.hbm [resolvable:$true] %s89_s30 }
   0xd   :  { %s35_s2 = smul.f32 %s99_s24, %s32_s23  ;;  %v58_v16 = vstv %s99_s24 }
   0xf   :  { %s36_s26 = sadd.f32 %s100_s25, %s35_s2 }
  0x10   :  { %39 = vperm.xlu0 %105, %v30_v2  }
  0x11   :  { %v60_v18 = vstv %s36_s26 }
  0x7a   :  { %v45_v3 = vpop.permute.xlu0 %44 }
  0x7b   :  { %v48_v5 = vmul.f32 %v45_v3, %v29_v4 }
  0x7d   :  { %v50_v9 = vsel %vm49_vm0, %v48_v5, 0.0 }
  0x82   :  { %v40_v7 = vpop.permute.xlu0 %39 }
  0x83   :  { %v47_v8 = vmul.f32 %v40_v7, %v28_v6 }
  0x85   :  { %v51_v10 = vadd.f32 %v50_v9, %v47_v8 }
  0x87   :  { %v52_v11 = vrot.slane %v51_v10, 4 }
  0x89   :  { %v53_v12 = vadd.f32 %v52_v11, %v51_v10 }
  0x8b   :  { %v54_v13 = vrot.slane %v53_v12, 2 }
  0x8d   :  { %v55_v14 = vadd.f32 %v54_v13, %v53_v12 }
  0x8f   :  { %v56_v15 = vrot.slane %v55_v14, 1 }
  0x91   :  { %v57_v17 = vadd.f32 %v56_v15, %v55_v14 }
  0x93   :  { %v59_v19 = vmul.f32 %v58_v16, %v57_v17 }
  0x95   :  { %v61_v20 = vadd.f32 %v60_v18, %v59_v19 }
  0x97   :  { %v101_v21 = vmul.f32 -1.442695, %v61_v20 }
  0x99   :  { %106 = vpow2.f32 %v101_v21 }
  0x9f   :  { %v107_v22 = vpop.eup %106 }
  0xa0   :  { %v65_v23 = vadd.f32 1.0, %v107_v22 }
  0xa2   :  { %108 = vrcp.f32 %v65_v23  ;;  %v77_v27 = vand.u32 2147483648, %v65_v23  ;;  %v75_v29 = vand.u32 2147483647, %v65_v23  ;;  %vm71_vm2 = vweird.f32 %v65_v23 }
  0xa4   :  { %v78_v31 = vor.u32 1.1754944e-38, %v77_v27  ;;  %vm76_vm4 = vcmp.eq.f32.partialorder %v75_v29, 8.507059e+37 }
  0xa8   :  { %v109_v24 = vpop.eup %108 }
  0xa9   :  { %v67_v25 = vmul.f32 %v109_v24, %v65_v23  ;;  %vm72_vm1 = vweird.f32 %v109_v24 }
  0xaa   :  { %vm73_vm3 = vmor %vm71_vm2, %vm72_vm1 }
  0xab   :  { %v68_v26 = vsub.f32 1.0, %v67_v25 }
  0xad   :  { %v69_v28 = vmul.f32 %v109_v24, %v68_v26 }
  0xaf   :  { %v70_v30 = vadd.f32 %v109_v24, %v69_v28 }
  0xb1   :  { %v74_v32 = vsel %vm73_vm3, %v109_v24, %v70_v30 }
  0xb2   :  { %v79_v33 = vsel %vm76_vm4, %v78_v31, %v74_v32 }
  0xb3   :  { %81 = vst [vmem:[#allocation5] sm:$0x1] %v79_v33 }
  0xb4   :  { %92 = dma.vmem_to_hbm [thread:$0]  %s88_s27, 16, %s90_s30, [#allocation3]  }
  0xb5   :  { %148 = dma.done.wait [#allocation3], 16  }
  0xb6   :  { %149 = vsyncadd [#allocation3], 4294967280 }
  0xb7   :  { %97 = vsyncpa [#allocation3], 1 }
  0xb8   :  { %98 = vsyncpa [#allocation4], 1 }

</bundles_post_ra>
